<compile_context>
chip_gen: v6e
topology: v6e:2x2x1
jax: 0.10.0
libtpu: 0.0.40
codegen_flags: <defaults>
</compile_context>

<pallas_src>
import functools

import jax
import jax.numpy as jnp
from jax.experimental import pallas as pl
from jax.experimental.pallas import tpu as pltpu


_LANE = 128
_FUSED_BLOCK_BUDGET = 8 * 2**20   # max bytes for one (Bt, C, HW) x-block (fused path)
_TILE_BLOCK_BUDGET = 4 * 2**20    # max bytes for one HW-tiled x-block (tiled path)


def _round_up(x, m):
    return -(-x // m) * m


def _pad_to(a, shape):
    pads = tuple((0, s - d) for d, s in zip(a.shape, shape))
    if any(p[1] for p in pads):
        return jnp.pad(a, pads)
    return a


def _vmem_limit(block_bytes):
    # 2 in-bufs + 2 out-bufs of the big block, plus weights/slack.
    # Always lands in [32 MiB, 36 MiB] given the block budgets -> safe on v5e/v6e/v7x.
    return int(max(32 * 2**20, min(64 * 2**20, 4 * block_bytes + 4 * 2**20)))


# --------------------------------------------------------------------------
# Fused single-call kernel (all of B, C, HW resident).
# --------------------------------------------------------------------------
def _soca_fused_kernel(inv_hw, alpha_ref, x_ref, w1t_ref, b1_ref, w2t_ref,
                       b2_ref, o_ref):
    # x_ref: (Bt, C_pad, HW_pad) in native dtype (never copied whole to f32).
    x = x_ref[...]

    # Squeeze: spatial sum accumulated in f32, scaled by the true 1/(H*W)
    # (zero padding does not perturb the sum).
    y = jnp.sum(x.astype(jnp.float32), axis=-1) * inv_hw               # (Bt, C_pad)

    # Excitation: 1x1 convs with bias == dense layers; M = Bt (batched).
    h = jnp.dot(y, w1t_ref[...], preferred_element_type=jnp.float32) + b1_ref[...]
    a = alpha_ref[0]                                                    # PReLU slope
    h = jnp.where(h > 0, h, a * h)
    s = jnp.dot(h, w2t_ref[...], preferred_element_type=jnp.float32) + b2_ref[...]
    s = jax.nn.sigmoid(s).astype(o_ref.dtype)                           # (Bt, C_pad)

    # Scale + store in the native dtype (no f32 round trip of the big block).
    o_ref[...] = x * s[:, :, None]


# --------------------------------------------------------------------------
# Tiled two-pass kernels (large C*HW; bounded per-block VMEM).
# --------------------------------------------------------------------------
def _pool_sum_kernel(x_ref, sum_ref):
    @pl.when(pl.program_id(0) == 0)
    def _():
        sum_ref[...] = jnp.zeros_like(sum_ref)
    sum_ref[...] += jnp.sum(x_ref[...].astype(jnp.float32), axis=-1)


def _scale_kernel(x_ref, s_ref, o_ref):
    o_ref[...] = x_ref[...] * s_ref[...]


# --------------------------------------------------------------------------
# Wrapper
# --------------------------------------------------------------------------
def soca(x_nchw, w1, b1, w2, b2, alpha, *, force_tiled=False, hw_tile=None):
    """SOCA forward.

    x_nchw: (B, C, H, W)
    w1: (C//r, C), b1: (C//r,)   -- first 1x1 conv (bias=True)
    w2: (C, C//r), b2: (C,)      -- second 1x1 conv (bias=True)
    alpha: (1,)                  -- PReLU(num_parameters=1) slope
    """
    B, C, H, W = x_nchw.shape
    hidden = w1.shape[0]
    HW = H * W
    dtype = x_nchw.dtype
    itemsize = jnp.dtype(dtype).itemsize

    sub = {4: 8, 2: 16, 1: 32}.get(itemsize, 8)
    C_pad = _round_up(C, sub)
    HW_128 = _round_up(HW, _LANE)
    row_bytes = C_pad * HW_128 * itemsize
    inv_hw = 1.0 / float(HW)

    use_tiled = force_tiled or (row_bytes > _FUSED_BLOCK_BUDGET)

    # Tiny weight prep (shared by both paths); computed in f32.
    w1t = _pad_to(w1, (hidden, C_pad)).T.astype(jnp.float32)            # (C_pad, hidden)
    w2t = _pad_to(w2, (C_pad, hidden)).T.astype(jnp.float32)            # (hidden, C_pad)
    b1r = b1.astype(jnp.float32).reshape(1, hidden)
    b2r = _pad_to(b2.astype(jnp.float32), (C_pad,)).reshape(1, C_pad)
    alpha_f = alpha.astype(jnp.float32).reshape(1)

    x_flat = x_nchw.reshape(B, C, HW)

    if not use_tiled:
        # ---------------- fused single-call path ----------------
        bt = max(1, min(B, _FUSED_BLOCK_BUDGET // row_bytes))
        nb = -(-B // bt)
        Bp = nb * bt
        HW_pad = HW_128
        x_p = _pad_to(x_flat, (Bp, C_pad, HW_pad))
        block_bytes = bt * C_pad * HW_pad * itemsize

        out_p = pl.pallas_call(
            functools.partial(_soca_fused_kernel, inv_hw),
            out_shape=jax.ShapeDtypeStruct((Bp, C_pad, HW_pad), dtype),
            grid=(nb,),
            in_specs=[
                pl.BlockSpec(memory_space=pltpu.MemorySpace.SMEM),        # alpha
                pl.BlockSpec((bt, C_pad, HW_pad), lambda b: (b, 0, 0)),   # x
                pl.BlockSpec((C_pad, hidden), lambda b: (0, 0)),          # w1^T
                pl.BlockSpec((1, hidden), lambda b: (0, 0)),              # b1
                pl.BlockSpec((hidden, C_pad), lambda b: (0, 0)),          # w2^T
                pl.BlockSpec((1, C_pad), lambda b: (0, 0)),               # b2
            ],
            out_specs=pl.BlockSpec((bt, C_pad, HW_pad), lambda b: (b, 0, 0)),
            compiler_params=pltpu.CompilerParams(
                dimension_semantics=("parallel",),
                vmem_limit_bytes=_vmem_limit(block_bytes)),
        )(alpha_f, x_p, w1t, b1r, w2t, b2r)

        return out_p[:B, :C, :HW].reshape(B, C, H, W)

    # ---------------- tiled two-pass path ----------------
    if hw_tile is not None:
        hw_t = _round_up(hw_tile, _LANE)
    else:
        hw_t = max(_LANE,
                   (_TILE_BLOCK_BUDGET // (B * C_pad * itemsize)) // _LANE * _LANE)
    hw_t = min(hw_t, HW_128)
    HW_pad = _round_up(HW, hw_t)
    n_hw = HW_pad // hw_t
    x_p = _pad_to(x_flat, (B, C_pad, HW_pad))

    # Pass 1: HW-tiled global pooling (f32 sum accumulator resident in VMEM).
    pool_block = B * C_pad * hw_t * itemsize
    sums = pl.pallas_call(
        _pool_sum_kernel,
        out_shape=jax.ShapeDtypeStruct((B, C_pad), jnp.float32),
        grid=(n_hw,),
        in_specs=[pl.BlockSpec((B, C_pad, hw_t), lambda t: (0, 0, t))],
        out_specs=pl.BlockSpec((B, C_pad), lambda t: (0, 0)),
        compiler_params=pltpu.CompilerParams(
            dimension_semantics=("arbitrary",),
            vmem_limit_bytes=_vmem_limit(pool_block)),
    )(x_p)

    # Tiny excitation FC stack in plain JAX (negligible vs HBM streaming).
    y = sums[:B, :C] * inv_hw
    h = y @ w1.astype(jnp.float32).T + b1.astype(jnp.float32)
    h = jnp.where(h > 0, h, alpha_f[0] * h)
    s = jax.nn.sigmoid(h @ w2.astype(jnp.float32).T + b2.astype(jnp.float32))
    s_p = _pad_to(s.astype(dtype), (B, C_pad))[:, :, None]              # (B, C_pad, 1)

    # Pass 2: HW-tiled broadcast scale, 2-D parallel grid (uses both v7x TCs).
    scale_block = C_pad * hw_t * itemsize
    out_p = pl.pallas_call(
        _scale_kernel,
        out_shape=jax.ShapeDtypeStruct((B, C_pad, HW_pad), dtype),
        grid=(B, n_hw),
        in_specs=[
            pl.BlockSpec((1, C_pad, hw_t), lambda b, t: (b, 0, t)),
            pl.BlockSpec((1, C_pad, 1), lambda b, t: (b, 0, 0)),
        ],
        out_specs=pl.BlockSpec((1, C_pad, hw_t), lambda b, t: (b, 0, t)),
        compiler_params=pltpu.CompilerParams(
            dimension_semantics=("parallel", "parallel"),
            vmem_limit_bytes=_vmem_limit(scale_block)),
    )(x_p, s_p)

    return out_p[:B, :C, :HW].reshape(B, C, H, W)


def soca_ref(x, w1, b1, w2, b2, alpha):
    """Pure-JAX reference matching the PyTorch SOCA.forward."""
    y = jnp.mean(x, axis=(2, 3))                        # AdaptiveAvgPool2d(1)
    h = y @ w1.T + b1                                   # Conv2d 1x1 (bias=True)
    h = jnp.where(h > 0, h, alpha[0] * h)               # PReLU(num_parameters=1)
    s = jax.nn.sigmoid(h @ w2.T + b2)                   # Conv2d 1x1 + Sigmoid
    return x * s[:, :, None, None]


if __name__ == "__main__":
    # Shapes consistent with SOCA(channel=32, reduction=16) -> hidden=2.
    B, C, H, W = 2, 32, 16, 16
    reduction = 16
    hidden = C // reduction

    key = jax.random.PRNGKey(0)
    kx, k1, kb1, k2, kb2 = jax.random.split(key, 5)

    x = jax.random.normal(kx, (B, C, H, W), dtype=jnp.float32)
    bound1 = 1.0 / (C ** 0.5)
    bound2 = 1.0 / (hidden ** 0.5)
    w1 = jax.random.uniform(k1, (hidden, C), minval=-bound1, maxval=bound1,
                            dtype=jnp.float32)
    b1 = jax.random.uniform(kb1, (hidden,), minval=-bound1, maxval=bound1,
                            dtype=jnp.float32)
    w2 = jax.random.uniform(k2, (C, hidden), minval=-bound2, maxval=bound2,
                            dtype=jnp.float32)
    b2 = jax.random.uniform(kb2, (C,), minval=-bound2, maxval=bound2,
                            dtype=jnp.float32)
    alpha = jnp.array([0.2], dtype=jnp.float32)         # PReLU init=0.2

    ref = soca_ref(x, w1, b1, w2, b2, alpha)

    # Fast (fused, batched single-block) path — the one used at these shapes.
    out = soca(x, w1, b1, w2, b2, alpha)
    jax.block_until_ready(out)
    assert out.shape == (B, C, H, W)
    assert jnp.allclose(out, ref, atol=1e-5, rtol=1e-5), "fused path mismatch"

    # Also validate the HW-tiled two-pass path (used for large C*HW on v7x).
    out_t = soca(x, w1, b1, w2, b2, alpha, force_tiled=True, hw_tile=128)
    jax.block_until_ready(out_t)
    assert jnp.allclose(out_t, ref, atol=1e-5, rtol=1e-5), "tiled path mismatch"

    print("KERNEL_OK")
</pallas_src>

<mosaic_0001>
module attributes {stable_mosaic.version = 11 : i64} {
  func.func @_soca_fused_kernel(%arg0: i32, %arg1: memref<1xf32, #tpu.memory_space<smem>>, %arg2: memref<2x32x256xf32, #tpu.memory_space<vmem>>, %arg3: memref<32x2xf32, #tpu.memory_space<vmem>>, %arg4: memref<1x2xf32, #tpu.memory_space<vmem>>, %arg5: memref<2x32xf32, #tpu.memory_space<vmem>>, %arg6: memref<1x32xf32, #tpu.memory_space<vmem>>, %arg7: memref<2x32x256xf32, #tpu.memory_space<vmem>>) attributes {dimension_semantics = [#tpu.dimension_semantics<parallel>], iteration_bounds = array<i64: 1>, scalar_prefetch = 0 : i64, scratch_operands = 0 : i64, tpu.core_type = #tpu.core_type<tc>, window_params = [{transform_indices = @transform_0, window_bounds = array<i64: 1>}, {transform_indices = @transform_1, window_bounds = array<i64: 2, 32, 256>}, {pipeline_mode = #tpu.pipeline_mode<synchronous>, transform_indices = @transform_2, window_bounds = array<i64: 32, 2>}, {pipeline_mode = #tpu.pipeline_mode<synchronous>, transform_indices = @transform_3, window_bounds = array<i64: 1, 2>}, {pipeline_mode = #tpu.pipeline_mode<synchronous>, transform_indices = @transform_4, window_bounds = array<i64: 2, 32>}, {pipeline_mode = #tpu.pipeline_mode<synchronous>, transform_indices = @transform_5, window_bounds = array<i64: 1, 32>}, {transform_indices = @transform_6, window_bounds = array<i64: 2, 32, 256>}]} {
    %c0 = arith.constant 0 : index
    %c0_0 = arith.constant 0 : index
    %c0_1 = arith.constant 0 : index
    %0 = vector.load %arg2[%c0, %c0_0, %c0_1] : memref<2x32x256xf32, #tpu.memory_space<vmem>>, vector<2x32x256xf32>
    %cst = arith.constant dense<0.000000e+00> : vector<2x32xf32>
    %1 = vector.multi_reduction <add>, %0, %cst [2] : vector<2x32x256xf32> to vector<2x32xf32>
    %cst_2 = arith.constant 3.906250e-03 : f32
    %2 = vector.broadcast %cst_2 : f32 to vector<2x32xf32>
    %3 = arith.mulf %1, %2 : vector<2x32xf32>
    %c0_3 = arith.constant 0 : index
    %c0_4 = arith.constant 0 : index
    %4 = vector.load %arg3[%c0_3, %c0_4] : memref<32x2xf32, #tpu.memory_space<vmem>>, vector<32x2xf32>
    %cst_5 = arith.constant dense<0.000000e+00> : vector<2x2xf32>
    %5 = tpu.matmul %3, %4, %cst_5 {dimension_numbers = #tpu.dot_dimension_numbers<[1], [0], [0], [1], [0, 0, 1, 1], [], []>} : vector<2x32xf32>, vector<32x2xf32>, vector<2x2xf32> -> vector<2x2xf32>
    %c0_6 = arith.constant 0 : index
    %c0_7 = arith.constant 0 : index
    %6 = vector.load %arg4[%c0_6, %c0_7] : memref<1x2xf32, #tpu.memory_space<vmem>>, vector<1x2xf32>
    %7 = vector.broadcast %6 : vector<1x2xf32> to vector<2x2xf32>
    %8 = arith.addf %5, %7 : vector<2x2xf32>
    %c0_8 = arith.constant 0 : index
    %9 = memref.load %arg1[%c0_8] : memref<1xf32, #tpu.memory_space<smem>>
    %cst_9 = arith.constant 0.000000e+00 : f32
    %10 = vector.broadcast %cst_9 : f32 to vector<2x2xf32>
    %11 = arith.cmpf ogt, %8, %10 : vector<2x2xf32>
    %12 = vector.broadcast %9 : f32 to vector<2x2xf32>
    %13 = arith.mulf %12, %8 : vector<2x2xf32>
    %14 = arith.select %11, %8, %13 : vector<2x2xi1>, vector<2x2xf32>
    %c0_10 = arith.constant 0 : index
    %c0_11 = arith.constant 0 : index
    %15 = vector.load %arg5[%c0_10, %c0_11] : memref<2x32xf32, #tpu.memory_space<vmem>>, vector<2x32xf32>
    %cst_12 = arith.constant dense<0.000000e+00> : vector<2x32xf32>
    %16 = tpu.matmul %14, %15, %cst_12 {dimension_numbers = #tpu.dot_dimension_numbers<[1], [0], [0], [1], [0, 0, 1, 1], [], []>} : vector<2x2xf32>, vector<2x32xf32>, vector<2x32xf32> -> vector<2x32xf32>
    %c0_13 = arith.constant 0 : index
    %c0_14 = arith.constant 0 : index
    %17 = vector.load %arg6[%c0_13, %c0_14] : memref<1x32xf32, #tpu.memory_space<vmem>>, vector<1x32xf32>
    %18 = vector.broadcast %17 : vector<1x32xf32> to vector<2x32xf32>
    %19 = arith.addf %16, %18 : vector<2x32xf32>
    %20 = arith.negf %19 : vector<2x32xf32>
    %21 = math.exp %20 : vector<2x32xf32>
    %cst_15 = arith.constant 1.000000e+00 : f32
    %22 = vector.broadcast %cst_15 : f32 to vector<2x32xf32>
    %23 = arith.addf %22, %21 : vector<2x32xf32>
    %24 = arith.divf %22, %23 : vector<2x32xf32>
    %25 = vector.shape_cast %24 : vector<2x32xf32> to vector<2x32x1xf32>
    %26 = vector.broadcast %25 : vector<2x32x1xf32> to vector<2x32x256xf32>
    %27 = arith.mulf %0, %26 : vector<2x32x256xf32>
    %c0_16 = arith.constant 0 : index
    %c0_17 = arith.constant 0 : index
    %c0_18 = arith.constant 0 : index
    %28 = vector.load %arg7[%c0_16, %c0_17, %c0_18] : memref<2x32x256xf32, #tpu.memory_space<vmem>>, vector<2x32x256xf32>
    tpu.vector_store %arg7[%c0_16, %c0_17, %c0_18], %27 {strides = array<i32>} : memref<2x32x256xf32, #tpu.memory_space<vmem>>, vector<2x32x256xf32>,
    return
  }
  func.func @transform_0(%arg0: i32) -> i32 {
    %c0_i32 = arith.constant 0 : i32
    %c0_i32_0 = arith.constant 0 : i32
    return %c0_i32 : i32
  }
  func.func @transform_1(%arg0: i32) -> (i32, i32, i32) {
    %c0_i32 = arith.constant 0 : i32
    %c0_i32_0 = arith.constant 0 : i32
    %c0_i32_1 = arith.constant 0 : i32
    return %arg0, %c0_i32, %c0_i32_0 : i32, i32, i32
  }
  func.func @transform_2(%arg0: i32) -> (i32, i32) {
    %c0_i32 = arith.constant 0 : i32
    %c0_i32_0 = arith.constant 0 : i32
    %c0_i32_1 = arith.constant 0 : i32
    return %c0_i32, %c0_i32_0 : i32, i32
  }
  func.func @transform_3(%arg0: i32) -> (i32, i32) {
    %c0_i32 = arith.constant 0 : i32
    %c0_i32_0 = arith.constant 0 : i32
    %c0_i32_1 = arith.constant 0 : i32
    return %c0_i32, %c0_i32_0 : i32, i32
  }
  func.func @transform_4(%arg0: i32) -> (i32, i32) {
    %c0_i32 = arith.constant 0 : i32
    %c0_i32_0 = arith.constant 0 : i32
    %c0_i32_1 = arith.constant 0 : i32
    return %c0_i32, %c0_i32_0 : i32, i32
  }
  func.func @transform_5(%arg0: i32) -> (i32, i32) {
    %c0_i32 = arith.constant 0 : i32
    %c0_i32_0 = arith.constant 0 : i32
    %c0_i32_1 = arith.constant 0 : i32
    return %c0_i32, %c0_i32_0 : i32, i32
  }
  func.func @transform_6(%arg0: i32) -> (i32, i32, i32) {
    %c0_i32 = arith.constant 0 : i32
    %c0_i32_0 = arith.constant 0 : i32
    %c0_i32_1 = arith.constant 0 : i32
    return %arg0, %c0_i32, %c0_i32_0 : i32, i32, i32
  }
}

</mosaic_0001>

<bundles_post_ra>
// kernel: tpu_custom_call.1
= control target key start
LH: loop header
LB: loop body
LE: loop exit
PB: predicated region body
PF: predicated region fallthrough
CT: control target
= control target key end

     0   :  { %12 = vsyncpa [#allocation4], 0  ;;  %s643_s0 = inlined_call_operand.<no memory space> [shape: f32[1], index: 0, kind: input, shape index: {}]   ;;  %s644_s1 = inlined_call_operand.hbm [shape: f32[2,32,256], index: 1, kind: input, shape index: {}]   ;;  %s645_s2 = inlined_call_operand.vmem [shape: f32[32,2], index: 2, kind: input, shape index: {}]   ;;  %s646_s3 = inlined_call_operand.vmem [shape: f32[1,2], index: 3, kind: input, shape index: {}]   ;;  %s647_s4 = inlined_call_operand.vmem [shape: f32[2,32], index: 4, kind: input, shape index: {}]   ;;  %s648_s5 = inlined_call_operand.vmem [shape: f32[1,32], index: 5, kind: input, shape index: {}]   ;;  %s649_s6 = inlined_call_operand.hbm [shape: f32[2,32,256], index: 6, kind: output, shape index: {}]  }
   0x1   :  { %13 = vsyncpa [#allocation5], 0  ;;  %s494_s21 = smov [#allocation3]  }
   0x2   :  { %s21_s22 = sshll.u32 %s494_s21, 4  ;;  %s22_s22 = int_to_ptr.vmem [resolvable:$true] %s21_s22 }
   0x3   :  { %s458_s23 = scalar_lea.vmem %s22_s22, 2048  ;;  %p463_p1 = scmp.lt.s32.totalorder %s22_s22, %s22_s22 }
   0x4   :  { %p459_p0 = scmp.ne.s32.totalorder %s22_s22, %s458_s23  ;;  %p464_p2 = scmp.lt.s32.totalorder %s458_s23, %s458_s23 }
   0x6   :  { %p465_p3 = por %p464_p2, %p463_p1 }
   0x8   :  { %p466_p4 = pnand %p465_p3, %p459_p0 }
   0xa   :  { %469 = shalt.err (!%p466_p4)
}
   0xb   :  { %s495_s24 = smov 256   ;;  %s496_s25 = smov 16  }
   0xc   :  { %27 = dma.hbm_to_vmem [thread:$0]  %s644_s1, 2048, %s22_s22, [#allocation4], %s495_s24, %s495_s24, %s496_s25  }
   0xd   :  { %490 = dma.done.wait [#allocation4], 2048  }
   0xe   :  { %491 = vsyncadd [#allocation4], 4294965248  ;;  %v541_v0 = vld [vmem:[#allocation3 + $0x40] sm:$0xff]  ;;  %v543_v1 = vld [vmem:[#allocation3 + $0x48] sm:$0xff]  ;;  %v497_v24 = vmov 0.0   ;;  %vm498_vm0 = vmmov 0   ;;  %v106_v29 = vlaneseq }
   0xf   :  { %v545_v2 = vld [vmem:[#allocation3] sm:$0xff]  ;;  %v67_v3 = vadd.f32 %v543_v1, %v541_v0  ;;  %v549_v4 = vld [vmem:[#allocation3 + $0x8] sm:$0xff]  ;;  %v551_v5 = vld [vmem:[#allocation3 + $0x50] sm:$0xff]  ;;  %424 = vmatprep.subr.mxu0 %v497_v24  ;;  %435 = vmatprep.subr.mxu1 %v497_v24  ;;  %vm117_vm1 = vcmask 130112   ;;  %vm124_vm2 = vcmask 195712   ;;  %vm131_vm3 = vcmask 261312  }
  0x10   :  { %v553_v6 = vld [vmem:[#allocation3 + $0x58] sm:$0xff]  ;;  %v55_v7 = vadd.f32 %v549_v4, %v545_v2  ;;  %v557_v8 = vld [vmem:[#allocation3 + $0x10] sm:$0xff]  ;;  %v565_v12 = vld [vmem:[#allocation3 + $0x60] sm:$0xff]  ;;  %432 = vmatprep.mubr.msk.f32.mxu0 %vm498_vm0, %v497_v24  ;;  %437 = vmatprep.mubr.msk.f32.mxu1 %vm498_vm0, %v497_v24  ;;  %v107_v31 = vand.u32 127, %v106_v29  ;;  %v601_v36 = vshrl.u32 %v106_v29, 7  ;;  %vm152_vm4 = vcmask 1041409  }
  0x11   :  { %v559_v9 = vld [vmem:[#allocation3 + $0x18] sm:$0xff]  ;;  %68 = vadd.xlane.f32.xlu1 %v67_v3  ;;  %v70_v10 = vadd.f32 %v553_v6, %v551_v5  ;;  %v567_v13 = vld [vmem:[#allocation3 + $0x68] sm:$0xff]  ;;  %v569_v14 = vld [vmem:[#allocation3 + $0x20] sm:$0xff]  ;;  %vm154_vm5 = vcmask 261120   ;;  %vm244_vm6 = vcmask 1041408   ;;  %vm240_vm8 = vcmask 15360  }
  0x12   :  { %56 = vadd.xlane.f32.xlu0 %v55_v7  ;;  %v58_v11 = vadd.f32 %v559_v9, %v557_v8  ;;  %v571_v15 = vld [vmem:[#allocation3 + $0x28] sm:$0xff]  ;;  %v73_v16 = vadd.f32 %v567_v13, %v565_v12  ;;  %v577_v18 = vld [vmem:[#allocation3 + $0x70] sm:$0xff]  ;;  %v579_v19 = vld [vmem:[#allocation3 + $0x78] sm:$0xff]  ;;  %v112_v33 = vadd.s32 4294967288, %v107_v31  ;;  %v119_v35 = vadd.s32 4294967280, %v107_v31 }
  0x13   :  { %v61_v17 = vadd.f32 %v571_v15, %v569_v14  ;;  %v581_v20 = vld [vmem:[#allocation3 + $0x30] sm:$0xff]  ;;  %v583_v21 = vld [vmem:[#allocation3 + $0x38] sm:$0xff]  ;;  %v76_v22 = vadd.f32 %v579_v19, %v577_v18  ;;  %v88_v27 = vld [vmem:[%s645_s2 + $0x8] sm:$0xff]  ;;  %v126_v40 = vadd.s32 4294967272, %v107_v31  ;;  %v110_v44 = vsub.s32 %v107_v31, %v601_v36 }
  0x14   :  { %v64_v23 = vadd.f32 %v583_v21, %v581_v20  ;;  %v90_v25 = vld [vmem:[%s645_s2 + $0x18] sm:$0xff]  ;;  %v89_v26 = vld [vmem:[%s645_s2 + $0x10] sm:$0xff]  ;;  %v87_v28 = vld [vmem:[%s645_s2] sm:$0xff]  ;;  %v115_v38 = vsub.s32 %v112_v33, %v601_v36  ;;  %v122_v42 = vsub.s32 %v119_v35, %v601_v36 }
  0x15   :  { %71 = vadd.xlane.f32.xlu1 %v70_v10  ;;  %425 = vmatpush3.msra.mxu0 %v90_v25  ;;  %v129_v51 = vsub.s32 %v126_v40, %v601_v36  ;;  %v229_v25 = vstv %s643_s0  ;;  %s499_s0 = smov [#allocation6]  }
  0x16   :  { %59 = vadd.xlane.f32.xlu0 %v58_v11  ;;  %426 = vmatprep.subr.mxu0 %v497_v24 }
  0x17   :  { %427 = vmatpush3.msra.mxu0 %v89_v26 }
  0x18   :  { %428 = vmatprep.subr.mxu0 %v497_v24 }
  0x19   :  { %74 = vadd.xlane.f32.xlu1 %v73_v16  ;;  %429 = vmatpush3.msra.mxu0 %v88_v27 }
  0x1a   :  { %62 = vadd.xlane.f32.xlu0 %v61_v17  ;;  %430 = vmatprep.subr.mxu0 %v497_v24 }
  0x1b   :  { %431 = vmatpush3.msra.mxu0 %v87_v28 }
  0x1d   :  { %77 = vadd.xlane.f32.xlu1 %v76_v22  ;;  %v232_v22 = vld [vmem:[%s647_s4] sm:$0x3] }
  0x1e   :  { %65 = vadd.xlane.f32.xlu0 %v64_v23  ;;  %436 = vmatpush3.msk.msra.mxu1 %vm244_vm6, %v232_v22  ;;  %v411_v23 = vld [vmem:[%s646_s3] ss:$0 sm:$0xff]  ;;  %s399_s3 = sshll.u32 %s499_s0, 4  ;;  %s400_s3 = int_to_ptr.vmem [resolvable:$true] %s399_s3 }
  0x1f   :  { %p475_p6 = scmp.lt.s32.totalorder %s400_s3, %s400_s3 }
  0x9a   :  { %v69_v30 = vpop.xlane.xlu1 %68 }
  0x9b   :  { %v57_v32 = vpop.xlane.xlu0 %56  ;;  %v83_v45 = vmul.f32 0.00390625, %v69_v30  ;;  %v413_v30 = vld [vmem:[%s648_s5] ss:$0 sm:$0xff]  ;;  %s470_s5 = scalar_lea.vmem %s400_s3, 2048 }
  0x9c   :  { %v79_v48 = vmul.f32 0.00390625, %v57_v32  ;;  %p471_p5 = scmp.ne.s32.totalorder %s400_s3, %s470_s5  ;;  %p476_p7 = scmp.lt.s32.totalorder %s470_s5, %s470_s5 }
  0x9d   :  { %v136_v55 = vrot.slane %v83_v45, %v110_v44 }
  0x9e   :  { %v72_v34 = vpop.xlane.xlu1 %71  ;;  %v111_v59 = vrot.slane %v79_v48, %v110_v44  ;;  %p477_p8 = por %p476_p7, %p475_p6 }
  0x9f   :  { %v60_v37 = vpop.xlane.xlu0 %59  ;;  %v84_v39 = vmul.f32 0.00390625, %v72_v34 }
  0xa0   :  { %v80_v41 = vmul.f32 0.00390625, %v60_v37  ;;  %p478_p9 = pnand %p477_p8, %p471_p5 }
  0xa1   :  { %v140_v50 = vrot.slane %v84_v39, %v115_v38 }
  0xa2   :  { %v75_v43 = vpop.xlane.xlu1 %74  ;;  %v116_v52 = vrot.slane %v80_v41, %v115_v38  ;;  %v326_v38 = vsub.s32 0, %v601_v36  ;;  %v345_v41 = vsub.s32 1, %v601_v36 }
  0xa3   :  { %v85_v46 = vmul.f32 0.00390625, %v75_v43  ;;  %v63_v47 = vpop.xlane.xlu0 %62  ;;  %v141_v61 = vsel %vm117_vm1, %v140_v50, %v136_v55 }
  0xa4   :  { %v81_v49 = vmul.f32 0.00390625, %v63_v47  ;;  %v118_v63 = vsel %vm117_vm1, %v116_v52, %v111_v59 }
  0xa5   :  { %v145_v53 = vrot.slane %v85_v46, %v122_v42 }
  0xa6   :  { %v78_v54 = vpop.xlane.xlu1 %77  ;;  %v123_v56 = vrot.slane %v81_v49, %v122_v42 }
  0xa7   :  { %v86_v57 = vmul.f32 0.00390625, %v78_v54  ;;  %v66_v58 = vpop.xlane.xlu0 %65  ;;  %v146_v3 = vsel %vm124_vm2, %v145_v53, %v141_v61 }
  0xa8   :  { %v82_v60 = vmul.f32 0.00390625, %v66_v58  ;;  %v125_v10 = vsel %vm124_vm2, %v123_v56, %v118_v63 }
  0xa9   :  { %v150_v62 = vrot.slane %v86_v57, %v129_v51 }
  0xaa   :  { %v130_v7 = vrot.slane %v82_v60, %v129_v51 }
  0xab   :  { %v151_v11 = vsel %vm131_vm3, %v150_v62, %v146_v3 }
  0xac   :  { %v132_v16 = vsel %vm131_vm3, %v130_v7, %v125_v10 }
  0xad   :  { %v153_v17 = vsel %vm152_vm4, %v151_v11, %v132_v16 }
  0xae   :  { %433 = vmatmul.mubr.msk.f32.vlgmr.msra.gmra.mxu0 %vm154_vm5, %v153_v17 }
 0x16e   :  { %v223_v24 = vpop.f32.mrf.mxu0 }
 0x16f   :  { %v224_v26 = vadd.f32 %v411_v23, %v223_v24 }
 0x170   :  { %v434_v27 = vpop.f32.mrf.mxu0 }
 0x171   :  { %vm228_vm7 = vcmp.gt.f32.partialorder %v224_v26, 0.0  ;;  %v230_v28 = vmul.f32 %v229_v25, %v224_v26 }
 0x173   :  { %v231_v29 = vsel %vm228_vm7, %v224_v26, %v230_v28 }
 0x174   :  { %438 = vmatmul.mubr.msk.f32.vlgmr.msra.gmra.mxu1 %vm240_vm8, %v231_v29 }
 0x234   :  { %v314_v31 = vpop.f32.mrf.mxu1 }
 0x235   :  { %v315_v32 = vadd.f32 %v413_v30, %v314_v31 }
 0x236   :  { %v439_v33 = vpop.f32.mrf.mxu1 }
 0x237   :  { %v416_v34 = vmul.f32 -1.442695, %v315_v32 }
 0x239   :  { %446 = vpow2.f32 %v416_v34 }
 0x246   :  { %v447_v35 = vpop.eup %446 }
 0x247   :  { %v321_v37 = vadd.f32 1.0, %v447_v35 }
 0x249   :  { %448 = vrcp.f32 %v321_v37 }
 0x256   :  { %v449_v39 = vpop.eup %448 }
 0x257   :  { %v327_v40 = vrot.slane %v449_v39, %v326_v38  ;;  %v346_v42 = vrot.slane %v449_v39, %v345_v41 }
 0x259   :  { %333 = vbcast.lane.b32.xlu1 %v327_v40, 264  ;;  %329 = vbcast.lane.b32.xlu0 %v327_v40, 256 }
 0x25d   :  { %337 = vbcast.lane.b32.xlu1 %v327_v40, 272  ;;  %348 = vbcast.lane.b32.xlu0 %v346_v42, 256 }
 0x261   :  { %341 = vbcast.lane.b32.xlu1 %v327_v40, 280  ;;  %356 = vbcast.lane.b32.xlu0 %v346_v42, 272 }
 0x265   :  { %352 = vbcast.lane.b32.xlu1 %v346_v42, 264 }
 0x269   :  { %360 = vbcast.lane.b32.xlu1 %v346_v42, 280 }
 0x2cb   :  { %v334_v43 = vpop.permute.xlu1 %333  ;;  %v330_v44 = vpop.permute.xlu0 %329 }
 0x2cc   :  { %v364_v45 = vmul.f32 %v334_v43, %v557_v8  ;;  %v365_v46 = vmul.f32 %v334_v43, %v559_v9  ;;  %v362_v47 = vmul.f32 %v330_v44, %v545_v2  ;;  %v363_v48 = vmul.f32 %v330_v44, %v549_v4 }
 0x2ce   :  { %380 = vst [vmem:[#allocation6 + $0x10] sm:$0xff] %v364_v45  ;;  %381 = vst [vmem:[#allocation6 + $0x18] sm:$0xff] %v365_v46 }
 0x2cf   :  { %378 = vst [vmem:[#allocation6] sm:$0xff] %v362_v47  ;;  %379 = vst [vmem:[#allocation6 + $0x8] sm:$0xff] %v363_v48  ;;  %v338_v36 = vpop.permute.xlu1 %337  ;;  %v349_v49 = vpop.permute.xlu0 %348 }
 0x2d0   :  { %v366_v50 = vmul.f32 %v338_v36, %v569_v14  ;;  %v367_v51 = vmul.f32 %v338_v36, %v571_v15  ;;  %v370_v52 = vmul.f32 %v349_v49, %v541_v0  ;;  %v371_v8 = vmul.f32 %v349_v49, %v543_v1 }
 0x2d2   :  { %382 = vst [vmem:[#allocation6 + $0x20] sm:$0xff] %v366_v50  ;;  %383 = vst [vmem:[#allocation6 + $0x28] sm:$0xff] %v367_v51 }
 0x2d3   :  { %386 = vst [vmem:[#allocation6 + $0x40] sm:$0xff] %v370_v52  ;;  %387 = vst [vmem:[#allocation6 + $0x48] sm:$0xff] %v371_v8  ;;  %v342_v2 = vpop.permute.xlu1 %341  ;;  %v357_v4 = vpop.permute.xlu0 %356 }
 0x2d4   :  { %v368_v9 = vmul.f32 %v342_v2, %v581_v20  ;;  %v369_v53 = vmul.f32 %v342_v2, %v583_v21  ;;  %v374_v54 = vmul.f32 %v357_v4, %v565_v12  ;;  %v375_v14 = vmul.f32 %v357_v4, %v567_v13 }
 0x2d6   :  { %384 = vst [vmem:[#allocation6 + $0x30] sm:$0xff] %v368_v9  ;;  %385 = vst [vmem:[#allocation6 + $0x38] sm:$0xff] %v369_v53 }
 0x2d7   :  { %390 = vst [vmem:[#allocation6 + $0x60] sm:$0xff] %v374_v54  ;;  %391 = vst [vmem:[#allocation6 + $0x68] sm:$0xff] %v375_v14  ;;  %v353_v0 = vpop.permute.xlu1 %352 }
 0x2d8   :  { %v372_v1 = vmul.f32 %v353_v0, %v551_v5  ;;  %v373_v15 = vmul.f32 %v353_v0, %v553_v6 }
 0x2da   :  { %388 = vst [vmem:[#allocation6 + $0x50] sm:$0xff] %v372_v1  ;;  %389 = vst [vmem:[#allocation6 + $0x58] sm:$0xff] %v373_v15 }
 0x2db   :  { %v361_v20 = vpop.permute.xlu1 %360 }
 0x2dc   :  { %v376_v21 = vmul.f32 %v361_v20, %v577_v18  ;;  %v377_v12 = vmul.f32 %v361_v20, %v579_v19 }
 0x2de   :  { %392 = vst [vmem:[#allocation6 + $0x70] sm:$0xff] %v376_v21  ;;  %393 = vst [vmem:[#allocation6 + $0x78] sm:$0xff] %v377_v12 }
 0x2df   :  { %481 = shalt.err (!%p478_p9)
}
 0x2e0   :  { %405 = dma.vmem_to_hbm [thread:$0]  %s400_s3, 2048, %s649_s6, [#allocation5], %s495_s24, %s495_s24, %s496_s25  }
 0x2e1   :  { %492 = dma.done.wait [#allocation5], 2048  }
 0x2e2   :  { %493 = vsyncadd [#allocation5], 4294965248 }
 0x2e3   :  { %409 = vsyncpa [#allocation4], 1 }
 0x2e4   :  { %410 = vsyncpa [#allocation5], 1 }

</bundles_post_ra>
